<compile_context>
chip_gen: v7x
topology: tpu7x:2x2x1
jax: 0.10.0
libtpu: 0.0.40
codegen_flags: <defaults>
</compile_context>

<pallas_src>
import jax
import jax.numpy as jnp
from jax import lax
from jax.experimental import pallas as pl
from jax.experimental.pallas import tpu as pltpu


def _attention_kernel(enc_ref, v_ref, out_ref):
    # enc_ref: [T, bB, E]  encoder outputs (B-tile), f32 or bf16 stream
    # v_ref  : [bB, E]     precomputed features @ W (f32), per B-tile
    # out_ref: [bB, T]     softmax attention weights over steps
    v = v_ref[...]                                       # [bB, E] f32
    enc = enc_ref[...].astype(jnp.float32)               # [T, bB, E] f32 accumulate

    # Dropout(p=0) is the identity.
    # TODO(synk): nonzero dropout would need pltpu.prng_seed/prng_random_bits
    # masking on the pre-hoist [T, B, F] projection (the v-hoist no longer applies).

    # energies[t, b] = sum_e enc[t, b, e] * v[b, e]   (VPU mul + lane reduce over E)
    energies = jnp.sum(enc * v[None, :, :], axis=2)      # [T, bB]
    # Tiny XLU transpose (negligible vs the HBM stream); keeping T on lanes keeps
    # the output block legal for any T (last dim == full T) and matches the
    # module's [B, T] result layout directly.
    energies = energies.T                                # [bB, T]

    # Numerically stable softmax over the step axis (lanes), exact divide.
    m = jnp.max(energies, axis=1, keepdims=True)
    e = jnp.exp(energies - m)
    s = jnp.sum(e, axis=1, keepdims=True)
    out_ref[...] = (e / s).astype(out_ref.dtype)


# Per-buffer cap for the enc tile (in the input dtype). Small tiles
# (a) give the pipeline real depth (>= ~8 steps) so DMA overlaps compute,
# (b) bound the in-kernel f32 upcast/product temporaries (~2-3x the tile), and
# (c) fit comfortably in the default scoped-VMEM limit on v5e/v6e/v7x.
_ENC_TILE_BYTES = 2 << 20


def _choose_block_b(n_steps, n_samples, enc_dim, itemsize):
    """B-tile: multiple of 8, <= ~2 MiB per enc buffer, and >= ~8 grid steps."""
    if n_samples <= 8:
        return int(n_samples)                    # single full block (always legal)
    per_sample = max(n_steps * enc_dim * itemsize, 1)
    b_vmem = (_ENC_TILE_BYTES // per_sample) // 8 * 8          # VMEM cap
    b_steps = ((n_samples + 7) // 8 + 7) // 8 * 8              # ~8 grid steps
    block_b = max(8, min(n_samples, max(b_vmem, 8), b_steps))
    if block_b < n_samples:
        block_b = max(8, block_b // 8 * 8)       # (8,128) sublane rule on partial blocks
    return int(block_b)


def attention_forward(features, encoder_outputs, weight, bias=None, *, block_b=None):
    """features: [B, F], encoder_outputs: [T, B, E] (f32 or bf16),
    weight: [F, E] (nn.Linear out x in), bias: [F] or None.
    Returns softmax attention weights [B, T] (softmax over steps)."""
    T, B, E = encoder_outputs.shape
    # <features[b], bias> is constant over t -> cancels exactly in the softmax.
    del bias

    # Hoisted tiny projection: one XLA matmul instead of a per-tile MXU op.
    # HIGHEST precision keeps f32 math faithful to the PyTorch reference.
    v = jnp.dot(features.astype(jnp.float32), weight.astype(jnp.float32),
                precision=lax.Precision.HIGHEST)                     # [B, E]

    itemsize = jnp.dtype(encoder_outputs.dtype).itemsize
    if block_b is None:
        block_b = _choose_block_b(T, B, E, itemsize)
    block_b = int(min(block_b, B))
    if block_b < B:
        block_b = max(8, block_b // 8 * 8)

    grid = (pl.cdiv(B, block_b),)

    cost = pl.CostEstimate(
        flops=2 * T * B * E,
        transcendentals=B * T,
        bytes_accessed=int(encoder_outputs.nbytes + v.nbytes + B * T * 4),
    )

    # TODO(synk): if T*E per sample is so large that even block_b=8 overflows the
    # tile budget (or B*E is tiny, hurting DMA contiguity of the B-strided block),
    # switch to T-tiling (contiguous (block_t, B, E) blocks) with online-softmax
    # m/l VMEM accumulators and an "arbitrary" T axis.
    return pl.pallas_call(
        _attention_kernel,
        out_shape=jax.ShapeDtypeStruct((B, T), jnp.float32),
        grid=grid,
        in_specs=[
            # enc: the only large stream, B-tiled; double-buffered by BlockSpec.
            # (If DMA is still exposed after the tile resize, pipeline_mode=
            #  pl.Buffered(3) on this spec is the next knob.)
            pl.BlockSpec((T, block_b, E), lambda i: (0, i, 0)),
            pl.BlockSpec((block_b, E), lambda i: (i, 0)),     # v: small, per B-tile
        ],
        out_specs=pl.BlockSpec((block_b, T), lambda i: (i, 0)),
        compiler_params=pltpu.CompilerParams(
            # Independent B-tiles -> megacore sharding on v7x; >= ~8 grid steps
            # keeps both TensorCores fed and the pipeline overlapped. Default
            # scoped-VMEM limit is ample for <=2 MiB tiles, so no override.
            dimension_semantics=("parallel",),
        ),
        cost_estimate=cost,
    )(encoder_outputs, v)


def attention_reference(features, encoder_outputs, weight, bias):
    # Faithful port of the PyTorch forward (bias included, full-f32 matmul).
    attn_out = jnp.einsum("tbe,fe->tbf", encoder_outputs, weight,
                          precision=lax.Precision.HIGHEST) + bias[None, None, :]
    energies = jnp.sum(attn_out * features[None, :, :], axis=2).T   # [B, T]
    return jax.nn.softmax(energies, axis=1)


if __name__ == "__main__":
    # Small synthetic shapes consistent with the module's forward.
    n_steps, n_samples = 8, 16
    feature_dim, encoder_output_dim = 32, 32

    key = jax.random.PRNGKey(0)
    k_feat, k_enc, k_w, k_b = jax.random.split(key, 4)

    features = jax.random.normal(k_feat, (n_samples, feature_dim), dtype=jnp.float32)
    encoder_outputs = jax.random.normal(
        k_enc, (n_steps, n_samples, encoder_output_dim), dtype=jnp.float32
    )
    # Deterministic nn.Linear parameters (synthetic, not a checkpoint load).
    weight = 0.1 * jax.random.normal(k_w, (feature_dim, encoder_output_dim), jnp.float32)
    bias = 0.1 * jax.random.normal(k_b, (feature_dim,), jnp.float32)

    # Auto tile selection gives block_b=8 -> grid=(2,), exercising the pipelined path.
    out = attention_forward(features, encoder_outputs, weight, bias)
    out = jax.block_until_ready(out)

    ref = attention_reference(features, encoder_outputs, weight, bias)
    assert out.shape == (n_samples, n_steps)
    # Exact divide + HIGHEST-precision projection -> tight f32 agreement
    # (the bias drop is mathematically exact under the row softmax).
    assert jnp.allclose(out, ref, atol=1e-4, rtol=1e-4), "mismatch vs reference"
    assert jnp.allclose(jnp.sum(out, axis=1), jnp.ones((n_samples,)), atol=1e-5)

    print("KERNEL_OK")
</pallas_src>

<mosaic_0001>
module attributes {stable_mosaic.version = 11 : i64} {
  func.func @_attention_kernel(%arg0: i32, %arg1: memref<8x8x32xf32, #tpu.memory_space<vmem>>, %arg2: memref<8x32xf32, #tpu.memory_space<vmem>>, %arg3: memref<8x8xf32, #tpu.memory_space<vmem>>) attributes {dimension_semantics = [#tpu.dimension_semantics<parallel>], iteration_bounds = array<i64: 2>, scalar_prefetch = 0 : i64, scratch_operands = 0 : i64, tpu.core_type = #tpu.core_type<tc>, window_params = [{transform_indices = @transform_0, window_bounds = array<i64: 8, 8, 32>}, {transform_indices = @transform_1, window_bounds = array<i64: 8, 32>}, {transform_indices = @transform_2, window_bounds = array<i64: 8, 8>}]} {
    %c0 = arith.constant 0 : index
    %c0_0 = arith.constant 0 : index
    %0 = vector.load %arg2[%c0, %c0_0] : memref<8x32xf32, #tpu.memory_space<vmem>>, vector<8x32xf32>
    %c0_1 = arith.constant 0 : index
    %c0_2 = arith.constant 0 : index
    %c0_3 = arith.constant 0 : index
    %1 = vector.load %arg1[%c0_1, %c0_2, %c0_3] : memref<8x8x32xf32, #tpu.memory_space<vmem>>, vector<8x8x32xf32>
    %2 = vector.shape_cast %0 : vector<8x32xf32> to vector<1x8x32xf32>
    %3 = vector.broadcast %2 : vector<1x8x32xf32> to vector<8x8x32xf32>
    %4 = arith.mulf %1, %3 : vector<8x8x32xf32>
    %cst = arith.constant dense<0.000000e+00> : vector<8x8xf32>
    %5 = vector.multi_reduction <add>, %4, %cst [2] : vector<8x8x32xf32> to vector<8x8xf32>
    %6 = tpu.transpose %5, [1, 0] : vector<8x8xf32> -> vector<8x8xf32>
    %cst_4 = arith.constant dense<0xFF800000> : vector<8xf32>
    %7 = vector.multi_reduction <maximumf>, %6, %cst_4 [1] : vector<8x8xf32> to vector<8xf32>
    %8 = vector.shape_cast %7 : vector<8xf32> to vector<8x1xf32>
    %9 = vector.broadcast %8 : vector<8x1xf32> to vector<8x8xf32>
    %10 = arith.subf %6, %9 : vector<8x8xf32>
    %11 = math.exp %10 : vector<8x8xf32>
    %cst_5 = arith.constant dense<0.000000e+00> : vector<8xf32>
    %12 = vector.multi_reduction <add>, %11, %cst_5 [1] : vector<8x8xf32> to vector<8xf32>
    %13 = vector.shape_cast %12 : vector<8xf32> to vector<8x1xf32>
    %14 = vector.broadcast %13 : vector<8x1xf32> to vector<8x8xf32>
    %15 = arith.divf %11, %14 : vector<8x8xf32>
    %c0_6 = arith.constant 0 : index
    %c0_7 = arith.constant 0 : index
    %16 = vector.load %arg3[%c0_6, %c0_7] : memref<8x8xf32, #tpu.memory_space<vmem>>, vector<8x8xf32>
    tpu.vector_store %arg3[%c0_6, %c0_7], %15 {strides = array<i32>} : memref<8x8xf32, #tpu.memory_space<vmem>>, vector<8x8xf32>,
    return
  }
  func.func @transform_0(%arg0: i32) -> (i32, i32, i32) {
    %c0_i32 = arith.constant 0 : i32
    %c0_i32_0 = arith.constant 0 : i32
    %c0_i32_1 = arith.constant 0 : i32
    return %c0_i32, %arg0, %c0_i32_0 : i32, i32, i32
  }
  func.func @transform_1(%arg0: i32) -> (i32, i32) {
    %c0_i32 = arith.constant 0 : i32
    %c0_i32_0 = arith.constant 0 : i32
    return %arg0, %c0_i32 : i32, i32
  }
  func.func @transform_2(%arg0: i32) -> (i32, i32) {
    %c0_i32 = arith.constant 0 : i32
    %c0_i32_0 = arith.constant 0 : i32
    return %arg0, %c0_i32 : i32, i32
  }
}

</mosaic_0001>

<bundles_post_ra>
// kernel: tpu_custom_call.1
= control target key start
LH: loop header
LB: loop body
LE: loop exit
PB: predicated region body
PF: predicated region fallthrough
CT: control target
= control target key end

     0   :  { %7 = vsyncpa [#allocation3], 0  ;;  %s775_s0 = inlined_call_operand.hbm [shape: f32[8,16,32], index: 0, kind: input, shape index: {}]   ;;  %s776_s1 = inlined_call_operand.hbm [shape: f32[16,32], index: 1, kind: input, shape index: {}]   ;;  %s777_s2 = inlined_call_operand.vmem [shape: f32[16,8], index: 2, kind: output, shape index: {}]  }
   0x1   :  { %9 = vsyncpa [#allocation3 + $0x1], 0 }
   0x2   :  { %10 = vsyncpa [#allocation5], 0 }
   0x3   :  { %12 = vsyncpa [#allocation5 + $0x1], 0  ;;  %s615_s9 = smov 0   ;;  %s617_s10 = smov 0  }
   0x4   :  { %s619_s11 = smov 0   ;;  %s621_s12 = smov 0  }
   0x5 LB: > { %s634_s13 = sadd.s32 4294967295, %s593_s12   ;;  %s637_s14 = sadd.s32 1, %s593_s12   ;;  %s593_s12 = sphi %s621_s12, %s787_s12   ;;  %s589_s11 = sphi %s619_s11, %s786_s11   ;;  %s585_s10 = sphi %s617_s10, %s785_s10   ;;  %s581_s9 = sphi %s615_s9, %s784_s9  }
   0x6   : > { %s22_s15 = ssub.s32 %s593_s12, %s637_s14  ;;  %s25_s16 = sadd.s32 1, %s589_s11 }
   0x7   : > { %p23_p0 = scmp.eq.s32.totalorder %s22_s15, 0  ;;  %p32_p1 = scmp.ne.s32.totalorder %s589_s11, %s585_s10 }
   0x8   : > { %p33_p2 = scmp.eq.s32.totalorder %s593_s12, 0  ;;  %p38_p3 = scmp.ne.s32.totalorder %s585_s10, %s581_s9 }
   0x9   : > { %s647_s17 = scalar_select %p23_p0, %s589_s11, %s25_s16  }
   0xa   : > { %p34_p4 = por %p33_p2, %p32_p1  ;;  %p39_p5 = scmp.eq.s32.totalorder %s634_s13, 0 }
   0xb   : > { %p454_p6 = scmp.lt.s32.totalorder %s593_s12, 2  ;;  %s656_s19 = sand.u32 1, %s589_s11  }
   0xc   : > { %p651_p7 = por %p39_p5, %p38_p3  ;;  %s433_s20 = sshll.u32 %s656_s19, 6 }
   0xd   : > { %s434_s21 = sshll.u32 %s593_s12, 7  ;;  %s118_s25 = scalar_lea.vmem [#allocation2], %s433_s20 }
   0xe   : > { %s779_s18 = scalar_select %p651_p7, 1, 0 }
   0xf   : > { %s665_s24 = scalar_lea.hbm %s775_s0, %s434_s21  ;;  %s124_s26 = sshll.u32 %s118_s25, 4  ;;  %s667_s26 = int_to_ptr.vmem [resolvable:$true] %s124_s26 }
  0x10   : > { %p669_p8 = pnand %p454_p6, %p34_p4  ;;  %s115_s28 = scalar_lea.sflag [#allocation3], %s656_s19 }
  0x11   : > { %s495_s29 = scalar_lea.hbm %s665_s24, 1024  ;;  %s500_s4 = scalar_lea.hbm %s775_s0, 2048 }
  0x12   : > { %p496_p9 = scmp.ne.s32.totalorder %s665_s24, %s495_s29  ;;  %p497_p10 = pneg %p669_p8 }
  0x13   : > { %p501_p13 = scmp.lt.u32.totalorder %s665_s24, %s775_s0  ;;  %p502_p0 = scmp.lt.u32.totalorder %s500_s4, %s495_s29 }
  0x14   : > { %p498_p11 = pnand %p497_p10, %p496_p9  ;;  %p504_p2 = scmp.lt.u32.totalorder %s495_s29, %s665_s24 }
  0x15   : > { %p503_p1 = por %p502_p0, %p501_p13 }
  0x16   : > { %p499_p12 = pneg %p498_p11 }
  0x17   : > { %p505_p3 = por %p504_p2, %p503_p1 }
  0x19   : > { %p506_p4 = pnand %p505_p3, %p499_p12 }
  0x1b   : > { %509 = shalt.err (!%p506_p4)
}
  0x1c   : > { %s510_s7 = scalar_lea.vmem %s667_s26, 1024  ;;  %s595_s8 = smov [#allocation2]  }
  0x1d   : > { %p511_p5 = scmp.ne.s32.totalorder %s667_s26, %s510_s7  ;;  %s515_s9 = sshll.u32 %s595_s8, 4  ;;  %s516_s9 = int_to_ptr.vmem [resolvable:$false] %s515_s9 }
  0x1e   : > { %s517_s15 = scalar_lea.vmem %s516_s9, 2048  ;;  %p518_p11 = scmp.lt.s32.totalorder %s667_s26, %s516_s9 }
  0x1f   : > { %p513_p6 = pnand %p511_p5, %p497_p10  ;;  %p519_p13 = scmp.lt.s32.totalorder %s517_s15, %s510_s7 }
  0x21   : > { %p514_p9 = pneg %p513_p6  ;;  %p520_p0 = por %p519_p13, %p518_p11 }
  0x23   : > { %p521_p1 = pnand %p520_p0, %p514_p9 }
  0x25   : > { %524 = shalt.err (!%p521_p1)
}
  0x26   : > { %s596_s16 = smov 256   ;;  %s597_s20 = smov 128  }
  0x27   : > { %s598_s22 = smov 8   ;;  %p437_p12 = scmp.ge.s32.totalorder %s593_s12, 1 }
  0x28   : > { %450 = dma.hbm_to_vmem [thread:$0]  (!%p669_p8), %s665_s24, 1024, %s667_s26, %s115_s28, %s596_s16, %s597_s20, %s598_s22  }
  0x29   : > { %p150_p2 = scmp.lt.s32.totalorder %s593_s12, 3  ;;  %s435_s23 = sshll.u32 %s656_s19, 3 }
  0x2a   : > { %s713_s3 = scalar_lea.hbm %s776_s1, %s434_s21  ;;  %s138_s4 = scalar_lea.vmem [#allocation4], %s435_s23 }
  0x2b   : > { %p704_p3 = pnand %p437_p12, %p150_p2  ;;  %s145_s5 = sshll.u32 %s138_s4, 4  ;;  %s146_s5 = int_to_ptr.vmem [resolvable:$true] %s145_s5 }
  0x2c   : > { %s135_s24 = scalar_lea.sflag [#allocation5], %s656_s19  ;;  %s525_s26 = scalar_lea.hbm %s713_s3, 128 }
  0x2d   : > { %s781_s25 = scalar_select %p704_p3, 1, 0 }
  0x2e   : > { %p526_p4 = scmp.ne.s32.totalorder %s713_s3, %s525_s26  ;;  %s530_s6 = scalar_lea.hbm %s776_s1, 256 }
  0x2f   : > { %p531_p9 = scmp.lt.u32.totalorder %s713_s3, %s776_s1  ;;  %p532_p11 = scmp.lt.u32.totalorder %s530_s6, %s525_s26 }
  0x30   : > { %p528_p5 = pnand %p526_p4, %p497_p10  ;;  %p534_p0 = scmp.lt.u32.totalorder %s525_s26, %s713_s3 }
  0x31   : > { %p533_p13 = por %p532_p11, %p531_p9 }
  0x32   : > { %p529_p6 = pneg %p528_p5 }
  0x33   : > { %p535_p1 = por %p534_p0, %p533_p13 }
  0x35   : > { %p536_p12 = pnand %p535_p1, %p529_p6 }
  0x37   : > { %539 = shalt.err (!%p536_p12)
}
  0x38   : > { %s540_s19 = scalar_lea.vmem %s146_s5, 128  ;;  %s599_s8 = smov [#allocation4]  }
  0x39   : > { %p541_p2 = scmp.ne.s32.totalorder %s146_s5, %s540_s19  ;;  %s545_s9 = sshll.u32 %s599_s8, 4  ;;  %s546_s9 = int_to_ptr.vmem [resolvable:$false] %s545_s9 }
  0x3a   : > { %s547_s15 = scalar_lea.vmem %s546_s9, 256  ;;  %p548_p7 = scmp.lt.s32.totalorder %s146_s5, %s546_s9 }
  0x3b   : > { %p543_p4 = pnand %p541_p2, %p497_p10  ;;  %p549_p3 = scmp.lt.s32.totalorder %s547_s15, %s540_s19 }
  0x3d   : > { %p544_p5 = pneg %p543_p4  ;;  %p550_p9 = por %p549_p3, %p548_p7 }
  0x3f   : > { %p551_p11 = pnand %p550_p9, %p544_p5 }
  0x41   : > { %554 = shalt.err (!%p551_p11)
}
  0x42   : > { %453 = dma.hbm_to_vmem [thread:$0]  (!%p669_p8), %s713_s3, 128, %s146_s5, %s135_s24  }
  0x43   : > { %p782_p6 = scmp.ne.s32.totalorder %s781_s25, 0 }
  0x44   : > { %s156_s16 = sand.u32 (!%p782_p6), 1, %s585_s10   ;;  %p783_p10 = scmp.ne.s32.totalorder (!%p782_p6), %s779_s18, 0 }
  0x45   : > { %154 = sbr.rel (%p782_p6) target bundleno = 687 (0x2af), region = 28  ;;  %s438_s20 = sshll.u32 (!%p782_p6), %s156_s16, 6 }
  0x46   : > { %s157_s22 = scalar_lea.sflag (!%p782_p6), [#allocation3], %s156_s16  ;;  %s160_s23 = scalar_lea.vmem (!%p782_p6), [#allocation2], %s438_s20 }
  0x4c   : > { %572 = dma.done.wait (%p783_p10), %s157_s22, 1024  }
  0x4d   : > { %574 = vsyncadd (%p783_p10), %s157_s22, 4294966272  ;;  %s439_s29 = sshll.u32 %s156_s16, 3  ;;  %s166_s30 = scalar_lea.sflag [#allocation5], %s156_s16 }
  0x4e   : > { %s169_s27 = scalar_lea.vmem [#allocation4], %s439_s29 }
  0x4f   : > { %576 = dma.done.wait (%p783_p10), %s166_s30, 128  }
  0x50   : > { %578 = vsyncadd (%p783_p10), %s166_s30, 4294967168  ;;  %v198_v0 = vld [vmem:[%s169_s27] sm:$0xff]  ;;  %vm215_vm0 = vcmask 261120   ;;  %v201_v2 = vld [vmem:[%s160_s23 + $0x10] sm:$0xff]  ;;  %v248_v25 = vlaneseq  ;;  %vm282_vm1 = vcmask 1041409   ;;  %vm284_vm2 = vcmask 1042434  }
  0x51   : > { %v199_v1 = vld [vmem:[%s160_s23] sm:$0xff]  ;;  %v209_v4 = vmul.f32 %v201_v2, %v198_v0  ;;  %v200_v5 = vld [vmem:[%s160_s23 + $0x8] sm:$0xff]  ;;  %v202_v6 = vld [vmem:[%s160_s23 + $0x18] sm:$0xff]  ;;  %vm286_vm3 = vcmask 1043459   ;;  %vm288_vm4 = vcmask 1044484   ;;  %vm290_vm5 = vcmask 1045509  }
  0x52   : > { %v207_v3 = vmul.f32 %v199_v1, %v198_v0  ;;  %v208_v7 = vmul.f32 %v200_v5, %v198_v0  ;;  %v210_v8 = vmul.f32 %v202_v6, %v198_v0  ;;  %v203_v9 = vld [vmem:[%s160_s23 + $0x20] sm:$0xff]  ;;  %v204_v10 = vld [vmem:[%s160_s23 + $0x28] sm:$0xff]  ;;  %v205_v17 = vld [vmem:[%s160_s23 + $0x30] sm:$0xff]  ;;  %v249_v26 = vand.u32 127, %v248_v25  ;;  %p194_p7 = scmp.lt.s32.totalorder %s634_s13, 1 }
  0x53   : > { %v222_v12 = vsel %vm215_vm0, %v209_v4, 0.0  ;;  %v211_v15 = vmul.f32 %v203_v9, %v198_v0  ;;  %v212_v16 = vmul.f32 %v204_v10, %v198_v0  ;;  %v206_v18 = vld [vmem:[%s160_s23 + $0x38] sm:$0xff]  ;;  %v213_v21 = vmul.f32 %v205_v17, %v198_v0 }
  0x54   : > { %v216_v11 = vsel %vm215_vm0, %v207_v3, 0.0  ;;  %223 = vadd.xlane.f32.xlu1 %v222_v12  ;;  %v219_v13 = vsel %vm215_vm0, %v208_v7, 0.0  ;;  %v225_v14 = vsel %vm215_vm0, %v210_v8, 0.0  ;;  %v214_v22 = vmul.f32 %v206_v18, %v198_v0  ;;  %s789_s13 = smov (!%p194_p7, %s634_s13), 1 }
  0x55   : > { %217 = vadd.xlane.f32.xlu0 %v216_v11  ;;  %v228_v19 = vsel %vm215_vm0, %v211_v15, 0.0  ;;  %v231_v20 = vsel %vm215_vm0, %v212_v16, 0.0  ;;  %v234_v23 = vsel %vm215_vm0, %v213_v21, 0.0  ;;  %v251_v27 = vshrl.u32 %v248_v25, 7  ;;  %s440_s18 = sshll.u32 %s789_s13, 3 }
  0x56   : > { %v237_v24 = vsel %vm215_vm0, %v214_v22, 0.0  ;;  %vm292_vm6 = vcmask 1046534   ;;  %vm294_vm7 = vcmask 1047559   ;;  %vm329_vm8 = vcmask 64512   ;;  %s197_s4 = scalar_lea.vmem %s777_s2, %s440_s18 }
  0x57   : > { %v252_v30 = vsub.s32 %v249_v26, %v251_v27 }
  0x58   : > { %226 = vadd.xlane.f32.xlu1 %v225_v14 }
  0x59   : > { %220 = vadd.xlane.f32.xlu0 %v219_v13 }
  0x5c   : > { %232 = vadd.xlane.f32.xlu1 %v231_v20 }
  0x5d   : > { %229 = vadd.xlane.f32.xlu0 %v228_v19 }
  0x60   : > { %238 = vadd.xlane.f32.xlu1 %v237_v24 }
  0x61   : > { %235 = vadd.xlane.f32.xlu0 %v234_v23 }
  0xe1   : > { %v224_v29 = vpop.xlane.xlu1 %223 }
  0xe2   : > { %v218_v28 = vpop.xlane.xlu0 %217  ;;  %v261_v36 = vrot.slane %v224_v29, %v252_v30 }
  0xe3   : > { %v253_v33 = vrot.slane %v218_v28, %v252_v30 }
  0xe5   : > { %v227_v32 = vpop.xlane.xlu1 %226 }
  0xe6   : > { %v221_v31 = vpop.xlane.xlu0 %220  ;;  %v265_v35 = vrot.slane %v227_v32, %v252_v30 }
  0xe7   : > { %v257_v34 = vrot.slane %v221_v31, %v252_v30 }
  0xe9   : > { %v283_v37 = vsel %vm282_vm1, %v257_v34, %v253_v33  ;;  %v233_v40 = vpop.xlane.xlu1 %232 }
  0xea   : > { %v285_v38 = vsel %vm284_vm2, %v261_v36, %v283_v37  ;;  %v230_v39 = vpop.xlane.xlu0 %229  ;;  %v273_v43 = vrot.slane %v233_v40, %v252_v30 }
  0xeb   : > { %v287_v41 = vsel %vm286_vm3, %v265_v35, %v285_v38  ;;  %v269_v42 = vrot.slane %v230_v39, %v252_v30 }
  0xed   : > { %v289_v44 = vsel %vm288_vm4, %v269_v42, %v287_v41  ;;  %v239_v46 = vpop.xlane.xlu1 %238 }
  0xee   : > { %v236_v45 = vpop.xlane.xlu0 %235  ;;  %v281_v48 = vrot.slane %v239_v46, %v252_v30  ;;  %v291_v49 = vsel %vm290_vm5, %v273_v43, %v289_v44 }
  0xef   : > { %v277_v47 = vrot.slane %v236_v45, %v252_v30 }
  0xf1   : > { %v293_v50 = vsel %vm292_vm6, %v277_v47, %v291_v49 }
  0xf2   : > { %v295_v51 = vsel %vm294_vm7, %v281_v48, %v293_v50 }
  0xf3   : > { %297 = vxpose.xlu0.b32.start.end [1/1] (short) (narrow) %v295_v51, 8 }
 0x173   : > { %v313_v52 = vpop.trf.xlu0 }
 0x174   : > { %v330_v53 = vsel %vm329_vm8, %v313_v52, -inf }
 0x175   : > { %331 = vmax.xlane.f32.xlu1 %v330_v53 }
 0x202   : > { %v332_v54 = vpop.xlane.xlu1 %331 }
 0x203   : > { %v333_v55 = vsub.f32 %v313_v52, %v332_v54 }
 0x205   : > { %v334_v56 = vmul.f32 1.442695, %v333_v55 }
 0x207   : > { %491 = vpow2.f32 %v334_v56 }
 0x211   : > { %v492_v57 = vpop.eup %491 }
 0x212   : > { %v336_v58 = vsel %vm329_vm8, %v492_v57, 0.0 }
 0x213   : > { %337 = vadd.xlane.f32.xlu1 %v336_v58 }
 0x2a0   : > { %v338_v59 = vpop.xlane.xlu1 %337 }
 0x2a1   : > { %493 = vrcp.f32 %v338_v59 }
 0x2ab   : > { %v494_v60 = vpop.eup %493 }
 0x2ac   : > { %v340_v61 = vmul.f32 %v494_v60, %v492_v57 }
 0x2ae   : > { %341 = vst.msk [vmem:[%s197_s4] sm:$0xff] %vm329_vm8, %v340_v61 }
 0x2af PF: > { %p15_p8 = scmp.ge.s32.totalorder %s637_s14, 4   ;;  %s784_s9 = smov %s585_s10 }
 0x2b0   : > { %s785_s10 = smov %s589_s11  ;;  %s786_s11 = smov %s647_s17 }
 0x2b1   : > { %s787_s12 = smov %s637_s14  ;;  %17 = sbr.rel (!%p15_p8) target bundleno = 5 (0x5), region = 81 }
 0x2b8   :  { %361 = vsyncpa [#allocation3], 1 }
 0x2b9   :  { %363 = vsyncpa [#allocation3 + $0x1], 1 }
 0x2ba   :  { %364 = vsyncpa [#allocation5], 1 }
 0x2bb   :  { %366 = vsyncpa [#allocation5 + $0x1], 1 }

</bundles_post_ra>
